<compile_context>
chip_gen: v5e
topology: v5e:2x2
jax: 0.10.0
libtpu: 0.0.40
codegen_flags: <defaults>
</compile_context>

<pallas_src>
import math
import numpy as np
import jax
import jax.numpy as jnp
from jax.experimental import pallas as pl
from jax.experimental.pallas import tpu as pltpu


# ----------------------------------------------------------------------------
# Host-side gate construction (glue: tiny complex matrices, numpy, deterministic)
# ----------------------------------------------------------------------------
_I2 = np.eye(2, dtype=np.complex128)
_CNOT = np.array([[1, 0, 0, 0],
                  [0, 1, 0, 0],
                  [0, 0, 0, 1],
                  [0, 0, 1, 0]], dtype=np.complex128)


def _rot(phi, theta, omega):
    """Single-qubit Rot gate: RZ(omega) RY(theta) RZ(phi) (PennyLane convention)."""
    c = math.cos(theta / 2.0)
    s = math.sin(theta / 2.0)
    return np.array(
        [[np.exp(-1j * (phi + omega) / 2) * c, -np.exp(1j * (phi - omega) / 2) * s],
         [np.exp(-1j * (phi - omega) / 2) * s,  np.exp(1j * (phi + omega) / 2) * c]],
        dtype=np.complex128)


def _cnot_layer(n_qubits):
    gate1 = _CNOT
    for i in range(2, n_qubits, 2):
        gate1 = np.kron(gate1, _CNOT) if i + 1 < n_qubits else np.kron(gate1, _I2)
    gate2 = np.kron(_I2, _CNOT)
    for i in range(3, n_qubits, 2):
        gate2 = np.kron(gate2, _CNOT) if i + 1 < n_qubits else np.kron(gate2, _I2)
    return gate2 @ gate1


def _build_layer_unitaries(param):
    """param: (n_layers, n_qubits, 3) float -> (L, D, D) complex per-layer unitaries."""
    n_layers, n_qubits, _ = param.shape
    cl = _cnot_layer(n_qubits)
    mats = []
    for i in range(n_layers):
        x = np.array([[1.0 + 0j]], dtype=np.complex128)
        for j in range(n_qubits):
            x = np.kron(x, _rot(param[i, j, 0], param[i, j, 1], param[i, j, 2]))
        mats.append(cl @ x)
    return np.stack(mats, axis=0)


def _build_packed_circuit_matrix(param):
    """Compose all layers, fold the even-row measurement mask in, and pack for the kernel.

    Returns W (D, 2D) float32 with W = [Re(U_masked^T) | Im(U_masked^T)], so that for a
    real row-state x: x @ W = [Re(U_masked x) | Im(U_masked x)] and the measurement
    probability is simply sum((x @ W)**2).
    """
    layer_U = _build_layer_unitaries(param)          # (L, D, D) complex
    D = layer_U.shape[-1]
    U = np.eye(D, dtype=np.complex128)
    for i in range(layer_U.shape[0]):
        U = layer_U[i] @ U                           # host pre-composition of the circuit
    U_masked = U.copy()
    U_masked[1::2, :] = 0.0                          # keep only even output amplitudes
    Ut = U_masked.T                                  # transpose (NOT conjugate): row form
    W = np.concatenate([Ut.real, Ut.imag], axis=1)   # (D, 2D)
    return layer_U, W.astype(np.float32)


# ----------------------------------------------------------------------------
# Pallas kernel: one fused real matmul + sum-of-squares measurement
# ----------------------------------------------------------------------------
def _qnn_kernel(w_ref, feat_ref, out_ref):
    # feat: (B, D) real amplitude rows; w: (D, 2D) packed [Re|Im] of masked circuit.
    p = jnp.dot(feat_ref[...], w_ref[...], preferred_element_type=jnp.float32)  # (B, 2D)
    prob = jnp.sum(p * p, axis=1, keepdims=True)                                # (B, 1)
    # lane-dense output slab: every lane of row b carries prob[b]; caller takes [:, 0]
    out_ref[...] = jnp.broadcast_to(prob, out_ref.shape)


def run_circuit_pallas(w, feats):
    """w: (D, 2D) f32 packed circuit matrix. feats: (B, D) f32. -> (B,) measurement probs."""
    feats = jnp.asarray(feats, dtype=jnp.float32)
    B, D = feats.shape
    Bp = max(8, ((B + 7) // 8) * 8)                  # pad batch to a sublane multiple of 8
    if Bp != B:
        feats = jnp.pad(feats, ((0, Bp - B), (0, 0)))
    # Single invocation, no grid: whole (tiny) operands live in VMEM.
    # NOTE: if n_qubits is scaled up so (D, 2D) no longer fits comfortably in VMEM,
    # add an N-axis grid over the 2D dimension (tiles multiple of 128/256) and set
    # pltpu.CompilerParams(vmem_limit_bytes=...) accordingly.
    out = pl.pallas_call(
        _qnn_kernel,
        out_shape=jax.ShapeDtypeStruct((Bp, 128), jnp.float32),
        in_specs=[pl.BlockSpec(memory_space=pltpu.MemorySpace.VMEM),
                  pl.BlockSpec(memory_space=pltpu.MemorySpace.VMEM)],
        out_specs=pl.BlockSpec(memory_space=pltpu.MemorySpace.VMEM),
    )(jnp.asarray(w, dtype=jnp.float32), feats)
    return out[:B, 0]


# ----------------------------------------------------------------------------
# QNN module equivalent
# ----------------------------------------------------------------------------
class QNNPallas:
    def __init__(self, n_qubits, n_layers, p=0, M=100, seed=0):
        self.p = p
        self.M = M
        self.n_qubits = n_qubits
        self.n_layers = n_layers
        # deterministic parameter init: Uniform(0, 2*pi), shape (n_layers, n_qubits, 3)
        key = jax.random.PRNGKey(seed)
        param = jax.random.uniform(key, (n_layers, n_qubits, 3),
                                   minval=0.0, maxval=2.0 * math.pi)
        self.param = np.asarray(param, dtype=np.float64)
        # per-layer unitaries kept (complex128) only for the numpy reference;
        # the kernel consumes the pre-composed, mask-folded, packed real matrix.
        self._layer_U, w = _build_packed_circuit_matrix(self.param)
        self.w = jnp.asarray(w)                      # (D, 2D) float32

    def reference_prob(self, feat):
        """Pure numpy reference of the circuit (for validation)."""
        state = np.asarray(feat, dtype=np.complex128)[:, None]
        for i in range(self.n_layers):
            state = self._layer_U[i] @ state
        return float(np.sum(np.abs(state[0::2, 0]) ** 2))

    def circuit_prob(self, feats):
        """Batched measurement probabilities for feats of shape (B, D)."""
        return run_circuit_pallas(self.w, feats)

    def __call__(self, feat, sample_key=None):
        feat = jnp.asarray(feat, dtype=jnp.float32)
        prob = self.circuit_prob(feat[None, :])[0]
        if self.p <= 0 and self.M <= 0:
            return prob
        if self.M <= 0:
            # Guard: the PyTorch code would sample an empty batch (NaN mean) here.
            return prob
        # Bernoulli branch of classifier() — stochastic sampling stays in JAX glue.
        # TODO(synk): torch.distributions Bernoulli sampling has no in-kernel equivalent;
        # it is done with jax.random outside the Pallas kernel.
        q = (1.0 - self.p) ** 20 * prob + (1.0 - (1.0 - self.p) ** 20) / 2.0
        q = jnp.clip(q, 0.0, 1.0)
        if sample_key is None:
            sample_key = jax.random.PRNGKey(1)
        samples = jax.random.bernoulli(sample_key, q, (self.M,)).astype(jnp.float32)
        return jnp.mean(samples)


# ----------------------------------------------------------------------------
if __name__ == "__main__":
    n_qubits = 4          # Hilbert dim D = 16
    n_layers = 3
    D = 2 ** n_qubits
    B = 8                 # batched feature rows (one vreg sublane group)

    model = QNNPallas(n_qubits=n_qubits, n_layers=n_layers, p=0, M=100, seed=0)

    # amplitude-embedded feature vectors (normalized so measurement prob is in [0,1])
    feat_key = jax.random.PRNGKey(0)
    feats = jax.random.normal(feat_key, (B, D), dtype=jnp.float32)
    feats = feats / jnp.linalg.norm(feats, axis=1, keepdims=True)

    # raw measurement probabilities straight from the Pallas kernel (batched)
    probs = model.circuit_prob(feats)
    probs = jax.block_until_ready(probs)

    # validate the kernel against the numpy reference circuit
    ref = np.array([model.reference_prob(np.asarray(feats[b])) for b in range(B)])
    err = np.max(np.abs(np.asarray(probs) - ref))
    assert err < 1e-3, (np.asarray(probs), ref, err)

    # full forward pass for one feature (includes Bernoulli-sampling branch, p=0, M=100)
    out = model(feats[0], sample_key=jax.random.PRNGKey(2))
    out = jax.block_until_ready(out)

    print("KERNEL_OK")
</pallas_src>

<mosaic_0001>
module attributes {stable_mosaic.version = 11 : i64} {
  func.func @_qnn_kernel(%arg0: memref<16x32xf32, #tpu.memory_space<vmem>>, %arg1: memref<8x16xf32, #tpu.memory_space<vmem>>, %arg2: memref<8x128xf32, #tpu.memory_space<vmem>>) attributes {dimension_semantics = [], scalar_prefetch = 0 : i64, scratch_operands = 0 : i64, tpu.core_type = #tpu.core_type<tc>} {
    %c0 = arith.constant 0 : index
    %c0_0 = arith.constant 0 : index
    %0 = vector.load %arg1[%c0, %c0_0] : memref<8x16xf32, #tpu.memory_space<vmem>>, vector<8x16xf32>
    %c0_1 = arith.constant 0 : index
    %c0_2 = arith.constant 0 : index
    %1 = vector.load %arg0[%c0_1, %c0_2] : memref<16x32xf32, #tpu.memory_space<vmem>>, vector<16x32xf32>
    %cst = arith.constant dense<0.000000e+00> : vector<8x32xf32>
    %2 = tpu.matmul %0, %1, %cst {dimension_numbers = #tpu.dot_dimension_numbers<[1], [0], [0], [1], [0, 0, 1, 1], [], []>} : vector<8x16xf32>, vector<16x32xf32>, vector<8x32xf32> -> vector<8x32xf32>
    %3 = arith.mulf %2, %2 : vector<8x32xf32>
    %cst_3 = arith.constant dense<0.000000e+00> : vector<8xf32>
    %4 = vector.multi_reduction <add>, %3, %cst_3 [1] : vector<8x32xf32> to vector<8xf32>
    %5 = vector.shape_cast %4 : vector<8xf32> to vector<8x1xf32>
    %6 = vector.shape_cast %5 : vector<8x1xf32> to vector<8x1xf32>
    %7 = vector.broadcast %6 : vector<8x1xf32> to vector<8x128xf32>
    %c0_4 = arith.constant 0 : index
    %c0_5 = arith.constant 0 : index
    %8 = vector.load %arg2[%c0_4, %c0_5] : memref<8x128xf32, #tpu.memory_space<vmem>>, vector<8x128xf32>
    tpu.vector_store %arg2[%c0_4, %c0_5], %7 {strides = array<i32>} : memref<8x128xf32, #tpu.memory_space<vmem>>, vector<8x128xf32>,
    return
  }
}

</mosaic_0001>

<bundles_post_ra>
// kernel: tpu_custom_call.1
= control target key start
LH: loop header
LB: loop body
LE: loop exit
PB: predicated region body
PF: predicated region fallthrough
CT: control target
= control target key end

     0   :  { %7 = vsyncpa [#allocation3], 0  ;;  %s206_s0 = inlined_call_operand.hbm [shape: f32[16,32], index: 0, kind: input, shape index: {}]   ;;  %s207_s1 = inlined_call_operand.hbm [shape: f32[8,16], index: 1, kind: input, shape index: {}]   ;;  %s208_s2 = inlined_call_operand.hbm [shape: f32[8,128], index: 2, kind: output, shape index: {}]  }
   0x1   :  { %8 = vsyncpa [#allocation6], 0 }
   0x2   :  { %9 = vsyncpa [#allocation4], 0  ;;  %s14_s11 = sshll.u32 %s206_s0, 4  ;;  %s177_s12 = smov [#allocation2]   ;;  %s15_s11 = int_to_ptr.hbm [resolvable:$true] %s14_s11 }
   0x3   :  { %s16_s13 = sshll.u32 %s177_s12, 4  ;;  %s28_s16 = sshll.u32 %s207_s1, 4  ;;  %s17_s13 = int_to_ptr.vmem [resolvable:$true] %s16_s13  ;;  %s29_s16 = int_to_ptr.hbm [resolvable:$true] %s28_s16 }
   0x4   :  { %s178_s17 = smov 128   ;;  %s179_s18 = smov 8  }
   0x5   :  { %22 = dma.hbm_to_vmem [thread:$0]  %s15_s11, 256, %s17_s13, [#allocation3], %s178_s17, %s178_s17, %s179_s18  }
   0x6   :  { %s180_s19 = smov [#allocation5]  }
   0x7   :  { %s30_s20 = sshll.u32 %s180_s19, 4  ;;  %s31_s20 = int_to_ptr.vmem [resolvable:$true] %s30_s20 }
   0x8   :  { %33 = dma.hbm_to_vmem [thread:$0]  %s29_s16, 128, %s31_s20, [#allocation6]  }
   0x9   :  { %171 = dma.done.wait [#allocation3], 256  }
   0xa   :  { %172 = vsyncadd [#allocation3], 4294967040 }
   0xb   :  { %173 = dma.done.wait [#allocation6], 128  }
   0xc   :  { %174 = vsyncadd [#allocation6], 4294967168  ;;  %v44_v0 = vld [vmem:[#allocation2 + $0x8] sm:$0xff]  ;;  %v43_v1 = vld [vmem:[#allocation2] sm:$0xff]  ;;  %vm45_vm0 = vcmask 130048   ;;  %vm70_vm1 = vcmask 261120  }
   0xd   :  { %63 = vmatpush.msra.mxu0 %v44_v0  ;;  %v42_v2 = vld [vmem:[#allocation5] sm:$0xff]  ;;  %s181_s0 = smov [#allocation7]   ;;  %s82_s23 = sshll.u32 %s208_s2, 4  ;;  %s83_s23 = int_to_ptr.hbm [resolvable:$true] %s82_s23 }
   0xe   :  { %s80_s1 = sshll.u32 %s181_s0, 4  ;;  %s81_s1 = int_to_ptr.vmem [resolvable:$true] %s80_s1 }
   0xf   :  { %64 = vmatpush.msra.mxu0 %v43_v1 }
  0x10   :  { %93 = vmatmul.msk.f32.vlgmr.msra.gmra.mxu0 %vm45_vm0, %v42_v2 }
  0x8d   :  { %v66_v3 = vpop.f32.mrf.mxu0 }
  0x8e   :  { %v69_v4 = vmul.f32 %v66_v3, %v66_v3 }
  0x90   :  { %v71_v5 = vsel %vm70_vm1, %v69_v4, 0.0 }
  0x91   :  { %72 = vadd.xlane.f32.xlu0 %v71_v5 }
 0x104   :  { %v73_v6 = vpop.xlane.xlu0 %72 }
 0x105   :  { %74 = vst [vmem:[#allocation7] sm:$0xff] %v73_v6 }
 0x106   :  { %85 = dma.vmem_to_hbm [thread:$0]  %s81_s1, 128, %s83_s23, [#allocation4]  }
 0x107   :  { %175 = dma.done.wait [#allocation4], 128  }
 0x108   :  { %176 = vsyncadd [#allocation4], 4294967168 }
 0x109   :  { %90 = vsyncpa [#allocation3], 1 }
 0x10a   :  { %91 = vsyncpa [#allocation6], 1 }
 0x10b   :  { %92 = vsyncpa [#allocation4], 1 }

</bundles_post_ra>
